<compile_context>
chip_gen: v7x
topology: tpu7x:2x2x1
jax: 0.10.0
libtpu: 0.0.40
codegen_flags: <defaults>
</compile_context>

<pallas_src>
import functools

import jax
import jax.numpy as jnp
from jax.experimental import pallas as pl
from jax.experimental.pallas import tpu as pltpu


# ----------------------------------------------------------------------------
# Kernel: fused twin-Q forward for one batch tile.
# ----------------------------------------------------------------------------
def _critic_kernel(hidden_width, s_ref, a_ref,
                   w1_ref, b1_ref, w2_ref, b2_ref,
                   r12_ref, br_ref, out_ref):
    H = hidden_width

    # --- Layer 1 (both heads): in-register [s; a] concat, one bf16 MXU pass:
    #     (TB, S+A) @ (S+A, 2H) + (1, 2H)
    x = jnp.concatenate(
        [s_ref[...].astype(jnp.bfloat16), a_ref[...].astype(jnp.bfloat16)],
        axis=-1)
    h = jnp.dot(x, w1_ref[...], preferred_element_type=jnp.float32) + b1_ref[...]
    h = jnp.maximum(h, 0.0)                                   # (TB, 2H) f32

    # --- Layer 2 (block-diagonal fused weight; 2H <= 128 so zero blocks are
    #     free lane padding): (TB, 2H) @ (2H, 2H) + (1, 2H)
    h = (jnp.dot(h.astype(jnp.bfloat16), w2_ref[...],
                 preferred_element_type=jnp.float32) + b2_ref[...])
    h = jnp.maximum(h, 0.0)                                   # (TB, 2H) f32

    # --- Readouts on VPU/XLU: one multiply with the packed readout row, two
    #     lane reduces, two direct slice stores (no width-2 concat relayout).
    hr = h * r12_ref[...]
    out_ref[:, 0:1] = jnp.sum(hr[:, :H], axis=-1, keepdims=True) + br_ref[:, 0:1]
    out_ref[:, 1:2] = jnp.sum(hr[:, H:], axis=-1, keepdims=True) + br_ref[:, 1:2]


# ----------------------------------------------------------------------------
# Parameter init (matches PyTorch nn.Linear default init; weights stored as
# (in_features, out_features) so forward is  y = x @ W + b).
# ----------------------------------------------------------------------------
def init_params(key, state_dim, action_dim, hidden_width):
    in_dim = int(state_dim) + int(action_dim)
    dims = [
        ("q1_layer1", in_dim, hidden_width),
        ("q1_layer2", hidden_width, hidden_width),
        ("q1_readout", hidden_width, 1),
        ("q2_layer1", in_dim, hidden_width),
        ("q2_layer2", hidden_width, hidden_width),
        ("q2_readout", hidden_width, 1),
    ]
    params = {}
    for name, fan_in, fan_out in dims:
        key, kw, kb = jax.random.split(key, 3)
        bound = 1.0 / jnp.sqrt(jnp.float32(fan_in))
        params[name + "_w"] = jax.random.uniform(
            kw, (fan_in, fan_out), jnp.float32, -bound, bound)
        params[name + "_b"] = jax.random.uniform(
            kb, (1, fan_out), jnp.float32, -bound, bound)
    return params


def pack_params(params):
    """Pack the six per-head layers into the fused layout the kernel expects."""
    H = params["q1_layer2_w"].shape[0]

    # Fused layer-1 weight over the [s; a] concat, both heads side by side.
    w1 = jnp.concatenate([params["q1_layer1_w"], params["q2_layer1_w"]], axis=1)
    b1 = jnp.concatenate([params["q1_layer1_b"], params["q2_layer1_b"]], axis=1)

    # Block-diagonal fused layer-2 weight.
    # NOTE: only sensible while 2H <= 128 (zeros ride in lane padding); for
    # larger hidden widths use two separate (H, H) matmuls instead.
    z = jnp.zeros((H, H), jnp.float32)
    w2 = jnp.block([[params["q1_layer2_w"], z],
                    [z, params["q2_layer2_w"]]])               # (2H, 2H)
    b2 = jnp.concatenate([params["q1_layer2_b"], params["q2_layer2_b"]], axis=1)

    # One packed readout row: head 1 in lanes [:H], head 2 in lanes [H:].
    r12 = jnp.concatenate([params["q1_readout_w"][:, 0],
                           params["q2_readout_w"][:, 0]])[None, :]        # (1, 2H)
    br = jnp.concatenate([params["q1_readout_b"], params["q2_readout_b"]],
                         axis=1)                                          # (1, 2)

    # bf16 matmul operands; biases / readouts stay f32.
    return {"w1": w1.astype(jnp.bfloat16), "b1": b1,
            "w2": w2.astype(jnp.bfloat16), "b2": b2,
            "r12": r12, "br": br}


# ----------------------------------------------------------------------------
# Pallas-backed forward.
# ----------------------------------------------------------------------------
def _pick_batch_tile(batch, block_b):
    if batch <= 8:
        return batch                      # single full-array tile
    # >= 2 tiles so a 2-TensorCore part can split the batch axis, but never
    # more than block_b rows per tile; tiles are multiples of 8 sublanes.
    half = -(-batch // 2)
    return min(block_b, ((half + 7) // 8) * 8)


@functools.partial(jax.jit, static_argnames=("block_b",))
def basic_critic_forward(packed, s, a, *, block_b=4096):
    """s: (B, state_dim), a: (B, action_dim) -> (q1, q2), each (B, 1) f32.

    The kernel casts activations to bf16 internally; passing bf16 s/a also
    halves the activation DMA bytes.
    """
    B, S = s.shape
    A = a.shape[1]
    H = packed["b1"].shape[1] // 2

    tb = _pick_batch_tile(B, block_b)
    grid = (pl.cdiv(B, tb),)

    def row_spec(width):
        return pl.BlockSpec((tb, width), lambda i: (i, 0))

    def const_spec(arr):
        # Whole-array block, VMEM-resident across all batch tiles.
        return pl.BlockSpec(arr.shape, lambda i: (0, 0))

    out = pl.pallas_call(
        functools.partial(_critic_kernel, H),
        out_shape=jax.ShapeDtypeStruct((B, 2), jnp.float32),
        grid=grid,
        in_specs=[
            row_spec(S), row_spec(A),
            const_spec(packed["w1"]), const_spec(packed["b1"]),
            const_spec(packed["w2"]), const_spec(packed["b2"]),
            const_spec(packed["r12"]), const_spec(packed["br"]),
        ],
        out_specs=pl.BlockSpec((tb, 2), lambda i: (i, 0)),
        compiler_params=pltpu.CompilerParams(
            # On v7x, swapping this to pltpu.CORE_PARALLEL (with the >=2 tiles
            # guaranteed by _pick_batch_tile) shards the batch axis across
            # both TensorCores.
            dimension_semantics=("parallel",)),
    )(s, a,
      packed["w1"], packed["b1"], packed["w2"], packed["b2"],
      packed["r12"], packed["br"])

    return out[:, 0:1], out[:, 1:2]


# ----------------------------------------------------------------------------
# Plain-JAX reference (mirrors the PyTorch forward exactly, in f32).
# ----------------------------------------------------------------------------
def _reference_forward(params, s, a):
    x = jnp.concatenate([s, a], axis=1).astype(jnp.float32)

    def head(prefix):
        h = jnp.maximum(x @ params[f"{prefix}_layer1_w"]
                        + params[f"{prefix}_layer1_b"], 0.0)
        h = jnp.maximum(h @ params[f"{prefix}_layer2_w"]
                        + params[f"{prefix}_layer2_b"], 0.0)
        return h @ params[f"{prefix}_readout_w"] + params[f"{prefix}_readout_b"]

    return head("q1"), head("q2")


if __name__ == "__main__":
    state_dim, action_dim, hidden_width = 12, 4, 32

    key = jax.random.PRNGKey(0)
    kp, ks, ka = jax.random.split(key, 3)
    params = init_params(kp, state_dim, action_dim, hidden_width)
    packed = pack_params(params)

    def check(batch, key_s, key_a):
        s = jax.random.normal(key_s, (batch, state_dim), jnp.float32)
        a = jax.random.normal(key_a, (batch, action_dim), jnp.float32)
        q1, q2 = basic_critic_forward(packed, s, a)
        jax.block_until_ready((q1, q2))
        q1_ref, q2_ref = _reference_forward(params, s, a)
        assert q1.shape == (batch, 1) and q2.shape == (batch, 1)
        # bf16 MXU operands -> looser tolerance vs. the f32 reference.
        assert jnp.allclose(q1, q1_ref, atol=3e-2, rtol=3e-2), \
            float(jnp.max(jnp.abs(q1 - q1_ref)))
        assert jnp.allclose(q2, q2_ref, atol=3e-2, rtol=3e-2), \
            float(jnp.max(jnp.abs(q2 - q2_ref)))

    # Small single-tile batch, plus a ragged multi-tile batch (exercises the
    # padded-read / masked-writeback path on the trailing partial tile).
    check(8, ks, ka)
    k2s, k2a = jax.random.split(jax.random.PRNGKey(1))
    check(300, k2s, k2a)

    print("KERNEL_OK")
</pallas_src>

<mosaic_0001>
module attributes {stable_mosaic.version = 11 : i64} {
  func.func @_critic_kernel(%arg0: i32, %arg1: memref<8x12xf32, #tpu.memory_space<vmem>>, %arg2: memref<8x4xf32, #tpu.memory_space<vmem>>, %arg3: memref<16x64xbf16, #tpu.memory_space<vmem>>, %arg4: memref<1x64xf32, #tpu.memory_space<vmem>>, %arg5: memref<64x64xbf16, #tpu.memory_space<vmem>>, %arg6: memref<1x64xf32, #tpu.memory_space<vmem>>, %arg7: memref<1x64xf32, #tpu.memory_space<vmem>>, %arg8: memref<1x2xf32, #tpu.memory_space<vmem>>, %arg9: memref<8x2xf32, #tpu.memory_space<vmem>>) attributes {dimension_semantics = [#tpu.dimension_semantics<parallel>], iteration_bounds = array<i64: 1>, scalar_prefetch = 0 : i64, scratch_operands = 0 : i64, tpu.core_type = #tpu.core_type<tc>, window_params = [{transform_indices = @transform_0, window_bounds = array<i64: 8, 12>}, {transform_indices = @transform_1, window_bounds = array<i64: 8, 4>}, {pipeline_mode = #tpu.pipeline_mode<synchronous>, transform_indices = @transform_2, window_bounds = array<i64: 16, 64>}, {pipeline_mode = #tpu.pipeline_mode<synchronous>, transform_indices = @transform_3, window_bounds = array<i64: 1, 64>}, {pipeline_mode = #tpu.pipeline_mode<synchronous>, transform_indices = @transform_4, window_bounds = array<i64: 64, 64>}, {pipeline_mode = #tpu.pipeline_mode<synchronous>, transform_indices = @transform_5, window_bounds = array<i64: 1, 64>}, {pipeline_mode = #tpu.pipeline_mode<synchronous>, transform_indices = @transform_6, window_bounds = array<i64: 1, 64>}, {pipeline_mode = #tpu.pipeline_mode<synchronous>, transform_indices = @transform_7, window_bounds = array<i64: 1, 2>}, {transform_indices = @transform_8, window_bounds = array<i64: 8, 2>}]} {
    %c0 = arith.constant 0 : index
    %c0_0 = arith.constant 0 : index
    %0 = vector.load %arg1[%c0, %c0_0] : memref<8x12xf32, #tpu.memory_space<vmem>>, vector<8x12xf32>
    %1 = arith.truncf %0 : vector<8x12xf32> to vector<8x12xbf16>
    %c0_1 = arith.constant 0 : index
    %c0_2 = arith.constant 0 : index
    %2 = vector.load %arg2[%c0_1, %c0_2] : memref<8x4xf32, #tpu.memory_space<vmem>>, vector<8x4xf32>
    %3 = arith.truncf %2 : vector<8x4xf32> to vector<8x4xbf16>
    %4 = tpu.concatenate %1, %3 in 1 : vector<8x12xbf16>, vector<8x4xbf16> -> vector<8x16xbf16>
    %c0_3 = arith.constant 0 : index
    %c0_4 = arith.constant 0 : index
    %5 = vector.load %arg3[%c0_3, %c0_4] : memref<16x64xbf16, #tpu.memory_space<vmem>>, vector<16x64xbf16>
    %cst = arith.constant dense<0.000000e+00> : vector<8x64xf32>
    %6 = tpu.matmul %4, %5, %cst {dimension_numbers = #tpu.dot_dimension_numbers<[1], [0], [0], [1], [0, 0, 1, 1], [], []>} : vector<8x16xbf16>, vector<16x64xbf16>, vector<8x64xf32> -> vector<8x64xf32>
    %c0_5 = arith.constant 0 : index
    %c0_6 = arith.constant 0 : index
    %7 = vector.load %arg4[%c0_5, %c0_6] : memref<1x64xf32, #tpu.memory_space<vmem>>, vector<1x64xf32>
    %8 = vector.broadcast %7 : vector<1x64xf32> to vector<8x64xf32>
    %9 = arith.addf %6, %8 : vector<8x64xf32>
    %cst_7 = arith.constant 0.000000e+00 : f32
    %10 = vector.broadcast %cst_7 : f32 to vector<8x64xf32>
    %11 = arith.maximumf %9, %10 : vector<8x64xf32>
    %12 = arith.truncf %11 : vector<8x64xf32> to vector<8x64xbf16>
    %c0_8 = arith.constant 0 : index
    %c0_9 = arith.constant 0 : index
    %13 = vector.load %arg5[%c0_8, %c0_9] : memref<64x64xbf16, #tpu.memory_space<vmem>>, vector<64x64xbf16>
    %cst_10 = arith.constant dense<0.000000e+00> : vector<8x64xf32>
    %14 = tpu.matmul %12, %13, %cst_10 {dimension_numbers = #tpu.dot_dimension_numbers<[1], [0], [0], [1], [0, 0, 1, 1], [], []>} : vector<8x64xbf16>, vector<64x64xbf16>, vector<8x64xf32> -> vector<8x64xf32>
    %c0_11 = arith.constant 0 : index
    %c0_12 = arith.constant 0 : index
    %15 = vector.load %arg6[%c0_11, %c0_12] : memref<1x64xf32, #tpu.memory_space<vmem>>, vector<1x64xf32>
    %16 = vector.broadcast %15 : vector<1x64xf32> to vector<8x64xf32>
    %17 = arith.addf %14, %16 : vector<8x64xf32>
    %cst_13 = arith.constant 0.000000e+00 : f32
    %18 = vector.broadcast %cst_13 : f32 to vector<8x64xf32>
    %19 = arith.maximumf %17, %18 : vector<8x64xf32>
    %c0_14 = arith.constant 0 : index
    %c0_15 = arith.constant 0 : index
    %20 = vector.load %arg7[%c0_14, %c0_15] : memref<1x64xf32, #tpu.memory_space<vmem>>, vector<1x64xf32>
    %21 = vector.broadcast %20 : vector<1x64xf32> to vector<8x64xf32>
    %22 = arith.mulf %19, %21 : vector<8x64xf32>
    %23 = vector.extract_strided_slice %22 {offsets = [0, 0], sizes = [8, 32], strides = [1, 1]} : vector<8x64xf32> to vector<8x32xf32>
    %cst_16 = arith.constant dense<0.000000e+00> : vector<8xf32>
    %24 = vector.multi_reduction <add>, %23, %cst_16 [1] : vector<8x32xf32> to vector<8xf32>
    %25 = vector.shape_cast %24 : vector<8xf32> to vector<8x1xf32>
    %c0_17 = arith.constant 0 : index
    %c0_18 = arith.constant 0 : index
    %26 = vector.load %arg8[%c0_17, %c0_18] : memref<1x2xf32, #tpu.memory_space<vmem>>, vector<1x1xf32>
    %27 = vector.broadcast %26 : vector<1x1xf32> to vector<8x1xf32>
    %28 = arith.addf %25, %27 : vector<8x1xf32>
    %c0_19 = arith.constant 0 : index
    %c0_20 = arith.constant 0 : index
    %29 = vector.load %arg9[%c0_19, %c0_20] : memref<8x2xf32, #tpu.memory_space<vmem>>, vector<8x1xf32>
    tpu.vector_store %arg9[%c0_19, %c0_20], %28 {strides = array<i32>} : memref<8x2xf32, #tpu.memory_space<vmem>>, vector<8x1xf32>,
    %30 = vector.extract_strided_slice %22 {offsets = [0, 32], sizes = [8, 32], strides = [1, 1]} : vector<8x64xf32> to vector<8x32xf32>
    %cst_21 = arith.constant dense<0.000000e+00> : vector<8xf32>
    %31 = vector.multi_reduction <add>, %30, %cst_21 [1] : vector<8x32xf32> to vector<8xf32>
    %32 = vector.shape_cast %31 : vector<8xf32> to vector<8x1xf32>
    %c0_22 = arith.constant 0 : index
    %c1 = arith.constant 1 : index
    %33 = vector.load %arg8[%c0_22, %c1] : memref<1x2xf32, #tpu.memory_space<vmem>>, vector<1x1xf32>
    %34 = vector.broadcast %33 : vector<1x1xf32> to vector<8x1xf32>
    %35 = arith.addf %32, %34 : vector<8x1xf32>
    %c0_23 = arith.constant 0 : index
    %c1_24 = arith.constant 1 : index
    %36 = vector.load %arg9[%c0_23, %c1_24] : memref<8x2xf32, #tpu.memory_space<vmem>>, vector<8x1xf32>
    tpu.vector_store %arg9[%c0_23, %c1_24], %35 {strides = array<i32>} : memref<8x2xf32, #tpu.memory_space<vmem>>, vector<8x1xf32>,
    return
  }
  func.func @transform_0(%arg0: i32) -> (i32, i32) {
    %c0_i32 = arith.constant 0 : i32
    %c0_i32_0 = arith.constant 0 : i32
    return %arg0, %c0_i32 : i32, i32
  }
  func.func @transform_1(%arg0: i32) -> (i32, i32) {
    %c0_i32 = arith.constant 0 : i32
    %c0_i32_0 = arith.constant 0 : i32
    return %arg0, %c0_i32 : i32, i32
  }
  func.func @transform_2(%arg0: i32) -> (i32, i32) {
    %c0_i32 = arith.constant 0 : i32
    %c0_i32_0 = arith.constant 0 : i32
    %c0_i32_1 = arith.constant 0 : i32
    return %c0_i32, %c0_i32_0 : i32, i32
  }
  func.func @transform_3(%arg0: i32) -> (i32, i32) {
    %c0_i32 = arith.constant 0 : i32
    %c0_i32_0 = arith.constant 0 : i32
    %c0_i32_1 = arith.constant 0 : i32
    return %c0_i32, %c0_i32_0 : i32, i32
  }
  func.func @transform_4(%arg0: i32) -> (i32, i32) {
    %c0_i32 = arith.constant 0 : i32
    %c0_i32_0 = arith.constant 0 : i32
    %c0_i32_1 = arith.constant 0 : i32
    return %c0_i32, %c0_i32_0 : i32, i32
  }
  func.func @transform_5(%arg0: i32) -> (i32, i32) {
    %c0_i32 = arith.constant 0 : i32
    %c0_i32_0 = arith.constant 0 : i32
    %c0_i32_1 = arith.constant 0 : i32
    return %c0_i32, %c0_i32_0 : i32, i32
  }
  func.func @transform_6(%arg0: i32) -> (i32, i32) {
    %c0_i32 = arith.constant 0 : i32
    %c0_i32_0 = arith.constant 0 : i32
    %c0_i32_1 = arith.constant 0 : i32
    return %c0_i32, %c0_i32_0 : i32, i32
  }
  func.func @transform_7(%arg0: i32) -> (i32, i32) {
    %c0_i32 = arith.constant 0 : i32
    %c0_i32_0 = arith.constant 0 : i32
    %c0_i32_1 = arith.constant 0 : i32
    return %c0_i32, %c0_i32_0 : i32, i32
  }
  func.func @transform_8(%arg0: i32) -> (i32, i32) {
    %c0_i32 = arith.constant 0 : i32
    %c0_i32_0 = arith.constant 0 : i32
    return %arg0, %c0_i32 : i32, i32
  }
}

</mosaic_0001>

<bundles_post_ra>
// kernel: basic_critic_forward.1
= control target key start
LH: loop header
LB: loop body
LE: loop exit
PB: predicated region body
PF: predicated region fallthrough
CT: control target
= control target key end

     0   :  { %13 = vsyncpa [#allocation3], 0  ;;  %s455_s0 = inlined_call_operand.vmem [shape: f32[8,12], index: 0, kind: input, shape index: {}]   ;;  %s456_s1 = inlined_call_operand.vmem [shape: f32[8,4], index: 1, kind: input, shape index: {}]   ;;  %s457_s2 = inlined_call_operand.vmem [shape: bf16[16,64], index: 2, kind: input, shape index: {}]   ;;  %s458_s3 = inlined_call_operand.vmem [shape: f32[1,64], index: 3, kind: input, shape index: {}]   ;;  %s459_s4 = inlined_call_operand.hbm [shape: bf16[64,64], index: 4, kind: input, shape index: {}]   ;;  %s460_s5 = inlined_call_operand.vmem [shape: f32[1,64], index: 5, kind: input, shape index: {}]   ;;  %s461_s6 = inlined_call_operand.vmem [shape: f32[1,64], index: 6, kind: input, shape index: {}]   ;;  %s462_s7 = inlined_call_operand.hbm [shape: f32[1,2], index: 7, kind: input, shape index: {}]   ;;  %s463_s8 = inlined_call_operand.vmem [shape: f32[8,2], index: 8, kind: output, shape index: {}]  }
   0x1   :  { %14 = vsyncpa [#allocation5], 0  ;;  %s354_s27 = smov [#allocation2]   ;;  %s306_s9 = scalar_lea.hbm %s459_s4, 512 }
   0x2   :  { %s28_s28 = sshll.u32 %s354_s27, 4  ;;  %p307_p0 = scmp.ne.s32.totalorder %s459_s4, %s306_s9  ;;  %s29_s28 = int_to_ptr.vmem [resolvable:$true] %s28_s28 }
   0x3   :  { %p310_p1 = scmp.lt.u32.totalorder %s306_s9, %s459_s4 }
   0x5   :  { %p312_p2 = pnand %p310_p1, %p307_p0 }
   0x7   :  { %315 = shalt.err (!%p312_p2)
}
   0x8   :  { %s316_s14 = scalar_lea.vmem %s29_s28, 512  ;;  %p321_p4 = scmp.lt.s32.totalorder %s29_s28, %s29_s28 }
   0x9   :  { %p317_p3 = scmp.ne.s32.totalorder %s29_s28, %s316_s14  ;;  %p322_p5 = scmp.lt.s32.totalorder %s316_s14, %s316_s14 }
   0xb   :  { %p323_p6 = por %p322_p5, %p321_p4 }
   0xd   :  { %p324_p7 = pnand %p323_p6, %p317_p3 }
   0xf   :  { %327 = shalt.err (!%p324_p7)
}
  0x10   :  { %s355_s15 = smov 64   ;;  %s356_s16 = smov 4  }
  0x11   :  { %34 = dma.hbm_to_vmem [thread:$0]  %s459_s4, 512, %s29_s28, [#allocation3], %s355_s15, %s355_s15, %s356_s16  }
  0x12   :  { %s357_s19 = smov [#allocation4]   ;;  %s328_s23 = scalar_lea.hbm %s462_s7, 16 }
  0x13   :  { %s45_s20 = sshll.u32 %s357_s19, 4  ;;  %p329_p8 = scmp.ne.s32.totalorder %s462_s7, %s328_s23  ;;  %s46_s20 = int_to_ptr.vmem [resolvable:$true] %s45_s20 }
  0x14   :  { %p332_p9 = scmp.lt.u32.totalorder %s328_s23, %s462_s7 }
  0x16   :  { %p334_p10 = pnand %p332_p9, %p329_p8 }
  0x18   :  { %337 = shalt.err (!%p334_p10)
}
  0x19   :  { %s338_s29 = scalar_lea.vmem %s46_s20, 16  ;;  %s342_s4 = scalar_lea.vmem %s46_s20, 32 }
  0x1a   :  { %p339_p11 = scmp.ne.s32.totalorder %s46_s20, %s338_s29  ;;  %p343_p12 = scmp.lt.s32.totalorder %s46_s20, %s46_s20 }
  0x1b   :  { %p344_p13 = scmp.lt.s32.totalorder %s342_s4, %s338_s29 }
  0x1d   :  { %p345_p0 = por %p344_p13, %p343_p12 }
  0x1f   :  { %p346_p1 = pnand %p345_p0, %p339_p11 }
  0x21   :  { %349 = shalt.err (!%p346_p1)
}
  0x22   :  { %48 = dma.hbm_to_vmem [thread:$0]  %s462_s7, 16, %s46_s20, [#allocation5]  }
  0x23   :  { %350 = dma.done.wait [#allocation3], 512  }
  0x24   :  { %351 = vsyncadd [#allocation3], 4294966784 }
  0x25   :  { %352 = dma.done.wait [#allocation5], 16  }
  0x26   :  { %353 = vsyncadd [#allocation5], 4294967280  ;;  %v358_v0 = vmov 0.0   ;;  %vm359_vm0 = vmmov 0   ;;  %v58_v1 = vld [vmem:[%s456_s1] sm:$0xff]  ;;  %s360_s7 = smov 12  }
  0x27   :  { %275 = vmatprep.subr.bf16.mxu0 %v358_v0  ;;  %277 = vmatprep.mubr.msk.bf16.mxu0 %vm359_vm0, %v358_v0  ;;  %v59_v2 = vpack.c.bf16 %v58_v1, %v58_v1  ;;  %v301_v3 = vld [vmem:[%s457_s2] sm:$0xff]   ;;  %v303_v5 = vld [vmem:[#allocation2 + $0x8] sm:$0xff]   ;;  %vm63_vm1 = vcmask 97280   ;;  %vm82_vm2 = vcmask 130048   ;;  %v304_v10 = vld [vmem:[#allocation2 + $0x10] sm:$0xff]   ;;  %vm166_vm3 = vcmask 523264  }
  0x28   :  { %281 = vmatprep.subr.bf16.mxu1 %v358_v0  ;;  %289 = vmatprep.mubr.msk.bf16.mxu1 %vm359_vm0, %v358_v0  ;;  %v302_v4 = vld [vmem:[#allocation2] sm:$0xff]   ;;  %v305_v11 = vld [vmem:[#allocation2 + $0x18] sm:$0xff]   ;;  %vm219_vm4 = vcmask 261120   ;;  %vm231_vm5 = vcmask 7168   ;;  %vm248_vm6 = vcmask 15368  }
  0x29   :  { %61 = vrot.lane.b32.xlu0 %v59_v2, %s360_s7  ;;  %276 = vmatpush3.bf16.msra.mxu0 %v301_v3  ;;  %v56_v6 = vld [vmem:[%s455_s0] sm:$0xff] }
  0x2a   :  { %282 = vmatpush3.bf16.msra.mxu1 %v302_v4  ;;  %v57_v7 = vpack.c.bf16 %v56_v6, %v56_v6  ;;  %v256_v12 = vld [vmem:[%s458_s3] ss:$0 sm:$0xff]  ;;  %s361_s3 = smov 96  }
  0x2b   :  { %283 = vmatprep.subr.bf16.mxu1 %v358_v0  ;;  %v259_v20 = vld [vmem:[%s460_s5] ss:$0 sm:$0xff] }
  0x2c   :  { %v265_v24 = vld [vmem:[%s461_s6] ss:$0 sm:$0xff] }
  0x2d   :  { %v266_v32 = vld [vmem:[#allocation4] ss:$0 sm:$0xff] }
  0x2e   :  { %284 = vmatpush3.bf16.msra.mxu1 %v303_v5 }
  0x2f   :  { %285 = vmatprep.subr.bf16.mxu1 %v358_v0 }
  0x32   :  { %286 = vmatpush3.bf16.msra.mxu1 %v304_v10 }
  0x33   :  { %287 = vmatprep.subr.bf16.mxu1 %v358_v0 }
  0x36   :  { %288 = vmatpush3.bf16.msra.mxu1 %v305_v11 }
  0x9b   :  { %v62_v8 = vpop.permute.xlu0 %61 }
  0x9c   :  { %v66_v9 = vsel %vm63_vm1, %v57_v7, %v62_v8 }
  0x9d   :  { %278 = vmatmul.mubr.msk.bf16.vlgmr.msra.gmra.mrb[0].mxu0 %vm82_vm2, %v66_v9 }
 0x170   :  { %v119_v13 = vpop.f32.mrb[0].mxu0 }
 0x171   :  { %v120_v14 = vadd.f32 %v256_v12, %v119_v13  ;;  %v279_v15 = vpop.f32.mrb[1].mxu0 }
 0x172   :  { %v122_v16 = vpop.f32.mrb[2].mxu0 }
 0x173   :  { %v125_v17 = vmax.f32 %v120_v14, 0.0  ;;  %v280_v18 = vpop.f32.mrb[3].mxu0 }
 0x175   :  { %v126_v19 = vpack.c.bf16 %v125_v17, %v125_v17 }
 0x177   :  { %290 = vmatmul.mubr.msk.bf16.vlgmr.msra.gmra.mrb[0].mxu1 %vm166_vm3, %v126_v19 }
 0x24a   :  { %v204_v21 = vpop.f32.mrb[0].mxu1 }
 0x24b   :  { %v205_v22 = vadd.f32 %v259_v20, %v204_v21  ;;  %v291_v23 = vpop.f32.mrb[1].mxu1 }
 0x24c   :  { %v207_v25 = vpop.f32.mrb[2].mxu1 }
 0x24d   :  { %v210_v26 = vmax.f32 %v205_v22, 0.0  ;;  %v292_v27 = vpop.f32.mrb[3].mxu1 }
 0x24f   :  { %v218_v28 = vmul.f32 %v265_v24, %v210_v26 }
 0x251   :  { %234 = vrot.lane.b32.xlu0 %v218_v28, %s361_s3  ;;  %v220_v29 = vsel %vm219_vm4, %v218_v28, 0.0 }
 0x252   :  { %221 = vadd.xlane.f32.xlu1 %v220_v29 }
 0x2c3   :  { %v235_v30 = vpop.permute.xlu0 %234 }
 0x2c4   :  { %v237_v31 = vsel %vm219_vm4, %v235_v30, 0.0 }
 0x2c5   :  { %238 = vadd.xlane.f32.xlu1 %v237_v31 }
 0x2df   :  { %v222_v33 = vpop.xlane.xlu1 %221 }
 0x2e0   :  { %v230_v34 = vadd.f32 %v266_v32, %v222_v33 }
 0x2e2   :  { %232 = vst.msk [vmem:[%s463_s8] sm:$0xff] %vm231_vm5, %v230_v34 }
 0x352   :  { %v239_v35 = vpop.xlane.xlu1 %238 }
 0x353   :  { %v247_v36 = vadd.f32 %v266_v32, %v239_v35 }
 0x355   :  { %249 = vst.msk [vmem:[%s463_s8] sm:$0xff] %vm248_vm6, %v247_v36 }
 0x356   :  { %254 = vsyncpa [#allocation3], 1 }
 0x357   :  { %255 = vsyncpa [#allocation5], 1 }

</bundles_post_ra>
